<compile_context>
chip_gen: v7x
topology: tpu7x:2x2x1
jax: 0.10.0
libtpu: 0.0.40
codegen_flags: <defaults>
</compile_context>

<pallas_src>
import jax
import jax.numpy as jnp
from jax import lax
from jax.experimental import pallas as pl
from jax.experimental.pallas import tpu as pltpu


def _round_up(n, m):
    return ((n + m - 1) // m) * m


def prepare_params(params, compute_dtype=jnp.float32):
    """One-time preprocessing of ODConv parameters into kernel-ready layouts.

    compute_dtype: dtype of the large MXU operands (base kernel, fc_kernel weight).
    Use jnp.bfloat16 to halve the big HBM streams; accumulation stays f32.
    """
    base = params["base"]                       # [C_out, C_in, K, K]
    C_out, C_in, K, _ = base.shape
    KK = K * K
    KKC = KK * C_in
    # base kernel as a matrix with columns ordered (kh, kw, ci)
    base2 = jnp.transpose(base, (0, 2, 3, 1)).reshape(C_out, KKC)
    # fc_kernel weight rows are flattened (o, ci, kh, kw) in the PyTorch module; reorder
    # rows to (o, kh, kw, ci) to match base2's column order, then transpose so the
    # batched attention GEMM is lane-dense:  ctx [B, C_in] @ wk2dT [C_in, C_out*KKC].
    wk_perm = jnp.transpose(
        params["W_k"].reshape(C_out, C_in, K, K, C_in), (0, 2, 3, 1, 4)
    ).reshape(C_out * KKC, C_in)
    bk_row = jnp.transpose(
        params["b_k"].reshape(C_out, C_in, K, K), (0, 2, 3, 1)
    ).reshape(1, C_out * KKC)
    return {
        "kernel_size": K,
        "in_channels": C_in,
        "out_channels": C_out,
        "compute_dtype": compute_dtype,
        "base2": base2.astype(compute_dtype),           # [C_out, KKC]     (MXU operand)
        "wk2dT": wk_perm.T.astype(compute_dtype),       # [C_in, C_out*KKC](MXU operand)
        "bk_row": bk_row,                                # [1, C_out*KKC]  f32
        "w_s": params["W_s"], "b_s": params["b_s"],      # spatial attn FC (tiny, f32)
        "w_in": params["W_in"], "b_in": params["b_in"],  # in-channel attn FC (tiny, f32)
        "w_out": params["W_out"],                        # out-channel attn FC (in-kernel)
        "b_out_col": params["b_out"].reshape(C_out, 1),
        "bias_col": params["bias"].reshape(C_out, 1),
    }


def odconv2d_pallas(x, prep, stride=1, *, tile_cout=None, tile_hw=None,
                    vmem_limit_bytes=None):
    """ODConv forward.  Grid = (batch, C_out tiles, HW tiles)."""
    B, C_in, H, W = x.shape
    K = prep["kernel_size"]
    assert C_in == prep["in_channels"]
    C_out = prep["out_channels"]
    cdt = prep["compute_dtype"]
    KK = K * K
    KKC = KK * C_in
    pad = K // 2
    H_out = (H + 2 * pad - K) // stride + 1
    W_out = (W + 2 * pad - K) // stride + 1
    HW = H_out * W_out
    HWp = _round_up(HW, 128)                 # lane-dense output (no-op if already aligned)

    # ---- tiling ------------------------------------------------------------------
    # tile_cout: M dimension of the conv matmul; aim toward the 256-row MXU (v6e/v7x).
    if tile_cout is None:
        tile_cout = C_out if C_out <= 256 else 256
    assert C_out % tile_cout == 0, "tile_cout must divide C_out"
    assert tile_cout == C_out or tile_cout % 8 == 0, "tile_cout must be a multiple of 8"
    n_co = C_out // tile_cout
    # tile_hw: optional HW tiling (mainly for v7x's 64 MiB VMEM); default = no tiling.
    if tile_hw is None:
        tile_hw = HWp
    assert HWp % tile_hw == 0 and tile_hw % 128 == 0, "tile_hw must divide HWp, mult of 128"
    n_hw = HWp // tile_hw
    # TODO(synk): derive tile_hw / vmem_limit_bytes from pltpu.get_tpu_info() per chip
    # generation (v5e/v6e can afford much larger tiles than v7x).

    # ---- host/XLA attention pipeline (batched over B, computed once) --------------
    ctx = jnp.mean(x, axis=(2, 3))                                          # [B, C_in]
    a_sp = jax.nn.sigmoid(ctx @ prep["w_s"].T + prep["b_s"])                # [B, K*K]
    a_in = jax.nn.sigmoid(ctx @ prep["w_in"].T + prep["b_in"])              # [B, C_in]
    col = (a_sp[:, :, None] * a_in[:, None, :]).reshape(B, KKC)             # (kh,kw,ci)
    # fc_kernel attention: ONE batched GEMM — wk2dT streamed from HBM exactly once.
    a_k = jax.nn.sigmoid(
        jnp.dot(ctx.astype(cdt), prep["wk2dT"],
                preferred_element_type=jnp.float32) + prep["bk_row"])       # [B, C_out*KKC]
    attn_ki = (a_k.reshape(B, C_out, KKC) * col[:, None, :]).astype(cdt)    # [B, C_out, KKC]

    # ---- host-side im2col: lane-dense [K*K*C_in, HW] slab per sample --------------
    # (row order (kh, kw, ci) matches the prepared base-kernel column order)
    x_pad = jnp.pad(x, ((0, 0), (0, 0), (pad, pad), (pad, pad)))
    taps = []
    for kh in range(K):
        for kw in range(K):
            win = x_pad[:, :,
                        kh:kh + (H_out - 1) * stride + 1:stride,
                        kw:kw + (W_out - 1) * stride + 1:stride]            # [B,C_in,H_out,W_out]
            taps.append(win.reshape(B, C_in, HW))
    x_col = jnp.concatenate(taps, axis=1).astype(cdt)                       # [B, KKC, HW]
    if HWp != HW:
        x_col = jnp.pad(x_col, ((0, 0), (0, 0), (0, HWp - HW)))

    ctx3 = ctx.reshape(B, 1, C_in)                                          # [B, 1, C_in] f32

    # ---- fused Pallas kernel -------------------------------------------------------
    def kernel(ctx_ref, wout_ref, bout_ref, base2_ref, attn_ref, bias_ref,
               xcol_ref, out_ref, dyn_ref):
        # Dynamic kernel assembly only once per (batch, C_out-tile); reused across HW tiles.
        @pl.when(pl.program_id(2) == 0)
        def _():
            ctx_row = ctx_ref[0]                                            # [1, C_in] f32
            a_out = jax.nn.sigmoid(
                jnp.sum(wout_ref[...] * ctx_row, axis=1, keepdims=True)
                + bout_ref[...])                                            # [tco, 1]
            dyn = (base2_ref[...].astype(jnp.float32)
                   * attn_ref[0].astype(jnp.float32)
                   * a_out)                                                 # [tco, KKC] f32
            dyn_ref[...] = dyn.astype(dyn_ref.dtype)
        # Convolution for this HW tile: a single MXU matmul with f32 accumulation.
        acc = jnp.dot(dyn_ref[...], xcol_ref[0],
                      preferred_element_type=jnp.float32)                   # [tco, tile_hw]
        out_ref[0] = (acc + bias_ref[...]).astype(out_ref.dtype)

    out = pl.pallas_call(
        kernel,
        out_shape=jax.ShapeDtypeStruct((B, C_out, HWp), jnp.float32),
        grid=(B, n_co, n_hw),
        in_specs=[
            pl.BlockSpec((1, 1, C_in), lambda b, co, hw: (b, 0, 0)),        # ctx
            pl.BlockSpec((tile_cout, C_in), lambda b, co, hw: (co, 0)),     # W_out
            pl.BlockSpec((tile_cout, 1), lambda b, co, hw: (co, 0)),        # b_out
            pl.BlockSpec((tile_cout, KKC), lambda b, co, hw: (co, 0)),      # base kernel
            pl.BlockSpec((1, tile_cout, KKC), lambda b, co, hw: (b, co, 0)),  # a_k * col
            pl.BlockSpec((tile_cout, 1), lambda b, co, hw: (co, 0)),        # conv bias
            pl.BlockSpec((1, KKC, tile_hw), lambda b, co, hw: (b, 0, hw)),  # im2col slab
        ],
        out_specs=pl.BlockSpec((1, tile_cout, tile_hw),
                               lambda b, co, hw: (b, co, hw)),
        scratch_shapes=[pltpu.VMEM((tile_cout, KKC), cdt)],                 # dyn kernel
        compiler_params=pltpu.CompilerParams(
            dimension_semantics=("parallel", "parallel", "arbitrary"),
            vmem_limit_bytes=vmem_limit_bytes),
    )(ctx3, prep["w_out"], prep["b_out_col"], prep["base2"], attn_ki,
      prep["bias_col"], x_col)

    if HWp != HW:                              # skip the copy when already lane-aligned
        out = out[:, :, :HW]
    return out.reshape(B, C_out, H_out, W_out)


def odconv2d_ref(x, params, kernel_size, stride=1):
    """Pure-JAX reference mirroring the PyTorch module (per-sample conv for B>=1)."""
    B, C_in, H, W = x.shape
    K = kernel_size
    pad = K // 2
    C_out = params["base"].shape[0]
    sig = jax.nn.sigmoid
    ctx = jnp.mean(x, axis=(2, 3))                                          # [B, C_in]
    a_sp = sig(ctx @ params["W_s"].T + params["b_s"]).reshape(B, 1, 1, K, K)
    a_in = sig(ctx @ params["W_in"].T + params["b_in"]).reshape(B, 1, C_in, 1, 1)
    a_out = sig(ctx @ params["W_out"].T + params["b_out"]).reshape(B, C_out, 1, 1, 1)
    a_k = sig(ctx @ params["W_k"].T + params["b_k"]).reshape(B, C_out, C_in, K, K)
    dynk = params["base"][None] * a_out * a_in * a_sp * a_k
    outs = []
    for b in range(B):
        o = lax.conv_general_dilated(
            x[b:b + 1], dynk[b], (stride, stride), [(pad, pad), (pad, pad)],
            dimension_numbers=("NCHW", "OIHW", "NCHW"))
        outs.append(o + params["bias"][None, :, None, None])
    return jnp.concatenate(outs, axis=0)


def init_params(key, in_channels, out_channels, kernel_size):
    K = kernel_size
    ks = jax.random.split(key, 9)
    return {
        "base": jax.random.normal(ks[0], (out_channels, in_channels, K, K), jnp.float32),
        "bias": jnp.zeros((out_channels,), jnp.float32),
        "W_s": jax.random.normal(ks[1], (K * K, in_channels), jnp.float32) * 0.2,
        "b_s": jax.random.normal(ks[2], (K * K,), jnp.float32) * 0.1,
        "W_in": jax.random.normal(ks[3], (in_channels, in_channels), jnp.float32) * 0.2,
        "b_in": jax.random.normal(ks[4], (in_channels,), jnp.float32) * 0.1,
        "W_out": jax.random.normal(ks[5], (out_channels, in_channels), jnp.float32) * 0.2,
        "b_out": jax.random.normal(ks[6], (out_channels,), jnp.float32) * 0.1,
        "W_k": jax.random.normal(
            ks[7], (out_channels * in_channels * K * K, in_channels), jnp.float32) * 0.2,
        "b_k": jax.random.normal(
            ks[8], (out_channels * in_channels * K * K,), jnp.float32) * 0.1,
    }


if __name__ == "__main__":
    # Keep the XLA-side reference matmuls/convs at true f32 so the comparison is meaningful.
    jax.config.update("jax_default_matmul_precision", "highest")

    in_channels, out_channels, kernel_size, stride = 4, 16, 3, 1
    H, W = 16, 16

    key = jax.random.PRNGKey(0)
    kp, kx1, kx2 = jax.random.split(key, 3)
    params = init_params(kp, in_channels, out_channels, kernel_size)
    prep_f32 = prepare_params(params, jnp.float32)      # one-time preprocessing

    # 1) batch=1, f32: the only batch size the PyTorch forward actually supports.
    x1 = jax.random.normal(kx1, (1, in_channels, H, W), jnp.float32)
    out1 = jax.block_until_ready(odconv2d_pallas(x1, prep_f32, stride))
    ref1 = odconv2d_ref(x1, params, kernel_size, stride)
    assert out1.shape == ref1.shape
    assert jnp.allclose(out1, ref1, rtol=1e-3, atol=1e-3), "batch=1 mismatch"

    # 2) batch=2, f32, explicit C_out and HW tiling: exercises the full 3-D grid + scratch.
    x2 = jax.random.normal(kx2, (2, in_channels, H, W), jnp.float32)
    out2 = jax.block_until_ready(
        odconv2d_pallas(x2, prep_f32, stride, tile_cout=8, tile_hw=128))
    ref2 = odconv2d_ref(x2, params, kernel_size, stride)
    assert jnp.allclose(out2, ref2, rtol=1e-3, atol=1e-3), "batch=2 mismatch"

    # 3) batch=2, bf16 MXU operands (f32 accumulation): halves the large HBM streams.
    prep_bf16 = prepare_params(params, jnp.bfloat16)
    out3 = jax.block_until_ready(odconv2d_pallas(x2, prep_bf16, stride))
    err = jnp.max(jnp.abs(out3 - ref2))
    scale = jnp.max(jnp.abs(ref2))
    assert err < 0.05 * scale, "bf16 batch=2 mismatch"

    print("KERNEL_OK")
</pallas_src>

<mosaic_0001>
module attributes {stable_mosaic.version = 11 : i64} {
  func.func @kernel(%arg0: i32, %arg1: i32, %arg2: i32, %arg3: memref<1x1x4xf32, #tpu.memory_space<vmem>>, %arg4: memref<16x4xf32, #tpu.memory_space<vmem>>, %arg5: memref<16x1xf32, #tpu.memory_space<vmem>>, %arg6: memref<16x36xf32, #tpu.memory_space<vmem>>, %arg7: memref<1x16x36xf32, #tpu.memory_space<vmem>>, %arg8: memref<16x1xf32, #tpu.memory_space<vmem>>, %arg9: memref<1x36x256xf32, #tpu.memory_space<vmem>>, %arg10: memref<1x16x256xf32, #tpu.memory_space<vmem>>, %arg11: memref<16x36xf32, #tpu.memory_space<vmem>>) attributes {dimension_semantics = [#tpu.dimension_semantics<parallel>, #tpu.dimension_semantics<parallel>, #tpu.dimension_semantics<arbitrary>], iteration_bounds = array<i64: 1, 1, 1>, scalar_prefetch = 0 : i64, scratch_operands = 1 : i64, tpu.core_type = #tpu.core_type<tc>, window_params = [{transform_indices = @transform_0, window_bounds = array<i64: 1, 1, 4>}, {transform_indices = @transform_1, window_bounds = array<i64: 16, 4>}, {transform_indices = @transform_2, window_bounds = array<i64: 16, 1>}, {transform_indices = @transform_3, window_bounds = array<i64: 16, 36>}, {transform_indices = @transform_4, window_bounds = array<i64: 1, 16, 36>}, {transform_indices = @transform_5, window_bounds = array<i64: 16, 1>}, {transform_indices = @transform_6, window_bounds = array<i64: 1, 36, 256>}, {transform_indices = @transform_7, window_bounds = array<i64: 1, 16, 256>}]} {
    %c0_i32 = arith.constant 0 : i32
    %0 = arith.cmpi eq, %arg2, %c0_i32 : i32
    %1 = arith.extui %0 : i1 to i32
    %c0_i32_0 = arith.constant 0 : i32
    %2 = arith.cmpi ne, %1, %c0_i32_0 : i32
    scf.if %2 {
      %c0_10 = arith.constant 0 : index
      %c0_11 = arith.constant 0 : index
      %c0_12 = arith.constant 0 : index
      %13 = vector.load %arg3[%c0_10, %c0_11, %c0_12] : memref<1x1x4xf32, #tpu.memory_space<vmem>>, vector<1x1x4xf32>
      %14 = vector.shape_cast %13 : vector<1x1x4xf32> to vector<1x4xf32>
      %c0_13 = arith.constant 0 : index
      %c0_14 = arith.constant 0 : index
      %15 = vector.load %arg4[%c0_13, %c0_14] : memref<16x4xf32, #tpu.memory_space<vmem>>, vector<16x4xf32>
      %16 = vector.broadcast %14 : vector<1x4xf32> to vector<16x4xf32>
      %17 = arith.mulf %15, %16 : vector<16x4xf32>
      %cst_15 = arith.constant dense<0.000000e+00> : vector<16xf32>
      %18 = vector.multi_reduction <add>, %17, %cst_15 [1] : vector<16x4xf32> to vector<16xf32>
      %19 = vector.shape_cast %18 : vector<16xf32> to vector<16x1xf32>
      %c0_16 = arith.constant 0 : index
      %c0_17 = arith.constant 0 : index
      %20 = vector.load %arg5[%c0_16, %c0_17] : memref<16x1xf32, #tpu.memory_space<vmem>>, vector<16x1xf32>
      %21 = arith.addf %19, %20 : vector<16x1xf32>
      %22 = arith.negf %21 : vector<16x1xf32>
      %23 = math.exp %22 : vector<16x1xf32>
      %cst_18 = arith.constant 1.000000e+00 : f32
      %24 = vector.broadcast %cst_18 : f32 to vector<16x1xf32>
      %25 = arith.addf %24, %23 : vector<16x1xf32>
      %26 = arith.divf %24, %25 : vector<16x1xf32>
      %c0_19 = arith.constant 0 : index
      %c0_20 = arith.constant 0 : index
      %27 = vector.load %arg6[%c0_19, %c0_20] : memref<16x36xf32, #tpu.memory_space<vmem>>, vector<16x36xf32>
      %c0_21 = arith.constant 0 : index
      %c0_22 = arith.constant 0 : index
      %c0_23 = arith.constant 0 : index
      %28 = vector.load %arg7[%c0_21, %c0_22, %c0_23] : memref<1x16x36xf32, #tpu.memory_space<vmem>>, vector<1x16x36xf32>
      %29 = vector.shape_cast %28 : vector<1x16x36xf32> to vector<16x36xf32>
      %30 = arith.mulf %27, %29 : vector<16x36xf32>
      %31 = vector.broadcast %26 : vector<16x1xf32> to vector<16x36xf32>
      %32 = arith.mulf %30, %31 : vector<16x36xf32>
      %c0_24 = arith.constant 0 : index
      %c0_25 = arith.constant 0 : index
      %33 = vector.load %arg11[%c0_24, %c0_25] : memref<16x36xf32, #tpu.memory_space<vmem>>, vector<16x36xf32>
      tpu.vector_store %arg11[%c0_24, %c0_25], %32 {strides = array<i32>} : memref<16x36xf32, #tpu.memory_space<vmem>>, vector<16x36xf32>,
    } else {
    }
    %c0 = arith.constant 0 : index
    %c0_1 = arith.constant 0 : index
    %3 = vector.load %arg11[%c0, %c0_1] : memref<16x36xf32, #tpu.memory_space<vmem>>, vector<16x36xf32>
    %c0_2 = arith.constant 0 : index
    %c0_3 = arith.constant 0 : index
    %c0_4 = arith.constant 0 : index
    %4 = vector.load %arg9[%c0_2, %c0_3, %c0_4] : memref<1x36x256xf32, #tpu.memory_space<vmem>>, vector<1x36x256xf32>
    %5 = vector.shape_cast %4 : vector<1x36x256xf32> to vector<36x256xf32>
    %cst = arith.constant dense<0.000000e+00> : vector<16x256xf32>
    %6 = tpu.matmul %3, %5, %cst {dimension_numbers = #tpu.dot_dimension_numbers<[1], [0], [0], [1], [0, 0, 1, 1], [], []>, precision = #tpu.contract_precision<fp32>} : vector<16x36xf32>, vector<36x256xf32>, vector<16x256xf32> -> vector<16x256xf32>
    %c0_5 = arith.constant 0 : index
    %c0_6 = arith.constant 0 : index
    %7 = vector.load %arg8[%c0_5, %c0_6] : memref<16x1xf32, #tpu.memory_space<vmem>>, vector<16x1xf32>
    %8 = vector.broadcast %7 : vector<16x1xf32> to vector<16x256xf32>
    %9 = arith.addf %6, %8 : vector<16x256xf32>
    %c0_7 = arith.constant 0 : index
    %c0_8 = arith.constant 0 : index
    %c0_9 = arith.constant 0 : index
    %10 = vector.load %arg10[%c0_7, %c0_8, %c0_9] : memref<1x16x256xf32, #tpu.memory_space<vmem>>, vector<1x16x256xf32>
    %11 = vector.shape_cast %10 : vector<1x16x256xf32> to vector<16x256xf32>
    %12 = vector.shape_cast %9 : vector<16x256xf32> to vector<1x16x256xf32>
    tpu.vector_store %arg10[%c0_7, %c0_8, %c0_9], %12 {strides = array<i32>} : memref<1x16x256xf32, #tpu.memory_space<vmem>>, vector<1x16x256xf32>,
    return
  }
  func.func @transform_0(%arg0: i32, %arg1: i32, %arg2: i32) -> (i32, i32, i32) {
    %c0_i32 = arith.constant 0 : i32
    %c0_i32_0 = arith.constant 0 : i32
    %c0_i32_1 = arith.constant 0 : i32
    return %arg0, %c0_i32, %c0_i32_0 : i32, i32, i32
  }
  func.func @transform_1(%arg0: i32, %arg1: i32, %arg2: i32) -> (i32, i32) {
    %c0_i32 = arith.constant 0 : i32
    %c0_i32_0 = arith.constant 0 : i32
    return %arg1, %c0_i32 : i32, i32
  }
  func.func @transform_2(%arg0: i32, %arg1: i32, %arg2: i32) -> (i32, i32) {
    %c0_i32 = arith.constant 0 : i32
    %c0_i32_0 = arith.constant 0 : i32
    return %arg1, %c0_i32 : i32, i32
  }
  func.func @transform_3(%arg0: i32, %arg1: i32, %arg2: i32) -> (i32, i32) {
    %c0_i32 = arith.constant 0 : i32
    %c0_i32_0 = arith.constant 0 : i32
    return %arg1, %c0_i32 : i32, i32
  }
  func.func @transform_4(%arg0: i32, %arg1: i32, %arg2: i32) -> (i32, i32, i32) {
    %c0_i32 = arith.constant 0 : i32
    %c0_i32_0 = arith.constant 0 : i32
    return %arg0, %arg1, %c0_i32 : i32, i32, i32
  }
  func.func @transform_5(%arg0: i32, %arg1: i32, %arg2: i32) -> (i32, i32) {
    %c0_i32 = arith.constant 0 : i32
    %c0_i32_0 = arith.constant 0 : i32
    return %arg1, %c0_i32 : i32, i32
  }
  func.func @transform_6(%arg0: i32, %arg1: i32, %arg2: i32) -> (i32, i32, i32) {
    %c0_i32 = arith.constant 0 : i32
    %c0_i32_0 = arith.constant 0 : i32
    return %arg0, %c0_i32, %arg2 : i32, i32, i32
  }
  func.func @transform_7(%arg0: i32, %arg1: i32, %arg2: i32) -> (i32, i32, i32) {
    %c0_i32 = arith.constant 0 : i32
    return %arg0, %arg1, %arg2 : i32, i32, i32
  }
}

</mosaic_0001>

<bundles_post_ra>
// kernel: tpu_custom_call.1
= control target key start
LH: loop header
LB: loop body
LE: loop exit
PB: predicated region body
PF: predicated region fallthrough
CT: control target
= control target key end

     0   :  { %vm42_vm0 = vcmask 31744   ;;  %s1103_s0 = inlined_call_operand.vmem [shape: f32[1,1,4], index: 0, kind: input, shape index: {}]   ;;  %s1104_s1 = inlined_call_operand.vmem [shape: f32[16,4], index: 1, kind: input, shape index: {}]   ;;  %s1105_s2 = inlined_call_operand.vmem [shape: f32[16,1], index: 2, kind: input, shape index: {}]   ;;  %s1106_s3 = inlined_call_operand.vmem [shape: f32[16,36], index: 3, kind: input, shape index: {}]   ;;  %s1107_s4 = inlined_call_operand.vmem [shape: f32[1,16,36], index: 4, kind: input, shape index: {}]   ;;  %s1108_s5 = inlined_call_operand.vmem [shape: f32[16,1], index: 5, kind: input, shape index: {}]   ;;  %s1109_s6 = inlined_call_operand.vmem [shape: f32[1,36,256], index: 6, kind: input, shape index: {}]   ;;  %s1110_s7 = inlined_call_operand.hbm [shape: f32[1,16,256], index: 7, kind: output, shape index: {}]  }
   0x1   :  { %v762_v0 = vld [vmem:[%s1103_s0] ss:$0 sm:$0xff]  ;;  %v33_v2 = vld [vmem:[%s1104_s1 + $0x8] sm:$0xff] }
   0x2   :  { %v32_v1 = vld [vmem:[%s1104_s1] sm:$0xff]  ;;  %v41_v4 = vmul.f32 %v762_v0, %v33_v2 }
   0x3   :  { %v40_v3 = vmul.f32 %v762_v0, %v32_v1 }
   0x4   :  { %12 = vsyncpa [#allocation4], 0  ;;  %v46_v6 = vsel %vm42_vm0, %v41_v4, 0.0  ;;  %v876_v7 = vmov 0   ;;  %v49_v8 = vld [vmem:[%s1105_s2] sm:$0xff]  ;;  %v50_v11 = vld [vmem:[%s1105_s2 + $0x8] sm:$0xff] }
   0x5   :  { %v43_v5 = vsel %vm42_vm0, %v40_v3, 0.0  ;;  %842 = vset.pattern.permute.xlu1 %v876_v7  ;;  %843 = vset.pattern.permute.xlu0 %v876_v7  ;;  %v89_v21 = vld [vmem:[%s1109_s6 + $0x8] sm:$0xff]  ;;  %v91_v22 = vld [vmem:[%s1109_s6 + $0x18] sm:$0xff]  ;;  %v88_v24 = vld [vmem:[%s1109_s6] sm:$0xff]  ;;  %vm117_vm1 = vcmask 1043456   ;;  %v877_v57 = vmov 0.0  }
   0x6   :  { %44 = vadd.xlane.f32.xlu0 %v43_v5  ;;  %v124_v23 = vand.u32 4294901760, %v89_v21  ;;  %v90_v25 = vld [vmem:[%s1109_s6 + $0x10] sm:$0xff]  ;;  %v128_v27 = vand.u32 4294901760, %v91_v22  ;;  %v126_v28 = vand.u32 4294901760, %v88_v24  ;;  %v99_v30 = vld [vmem:[%s1108_s5 + $0x8] sm:$0xff]  ;;  %v95_v34 = vld [vmem:[%s1109_s6 + $0x38] sm:$0xff]  ;;  %525 = vmatprep.mubr.f32.mxu0 %v877_v57 }
   0x7   :  { %v130_v29 = vand.u32 4294901760, %v90_v25  ;;  %v93_v33 = vld [vmem:[%s1109_s6 + $0x28] sm:$0xff]  ;;  %v92_v39 = vld [vmem:[%s1109_s6 + $0x20] sm:$0xff]  ;;  %v94_v40 = vld [vmem:[%s1109_s6 + $0x30] sm:$0xff]  ;;  %v136_v42 = vand.u32 4294901760, %v95_v34  ;;  %198 = vmatprep.mubr.f32.mxu1 %v877_v57  ;;  %vm83_vm2 = vcmask 293888  }
   0x8   :  { %v951_v31 = vpack.c.bf16 %v128_v27, %v124_v23  ;;  %v961_v35 = vsub.f32 %v89_v21, %v124_v23  ;;  %v963_v36 = vsub.f32 %v91_v22, %v128_v27  ;;  %v965_v37 = vsub.f32 %v88_v24, %v126_v28  ;;  %v97_v45 = vld [vmem:[%s1109_s6 + $0x48] sm:$0xf]  ;;  %v96_v46 = vld [vmem:[%s1109_s6 + $0x40] sm:$0xf] }
   0x9   :  { %v953_v32 = vpack.c.bf16 %v130_v29, %v126_v28  ;;  %v967_v38 = vsub.f32 %v90_v25, %v130_v29  ;;  %v132_v41 = vand.u32 4294901760, %v93_v33  ;;  %v134_v43 = vand.u32 4294901760, %v92_v39 }
   0xa   :  { %47 = vadd.xlane.f32.xlu0 %v46_v6  ;;  %790 = vmatprep.subr.bf16.mxu0 %v951_v31  ;;  %v138_v44 = vand.u32 4294901760, %v94_v40  ;;  %v223_v47 = vand.u32 4294901760, %v961_v35  ;;  %v235_v48 = vand.u32 4294901760, %v963_v36  ;;  %v990_v51 = vsub.f32 %v95_v34, %v136_v42  ;;  %v67_v34 = vld [vmem:[%s1107_s4] sm:$0xff] }
   0xb   :  { %766 = vmatprep.subr.bf16.mxu1 %v951_v31  ;;  %792 = vmatpush1.bf16.msra.mxu0 %v953_v32  ;;  %v986_v49 = vpack.c.bf16 %v136_v42, %v132_v41  ;;  %v988_v50 = vsub.f32 %v93_v33, %v132_v41  ;;  %v995_v53 = vsub.f32 %v92_v39, %v134_v43  ;;  %v999_v55 = vsel %vm117_vm1, %v97_v45, 0  ;;  %v65_v33 = vld [vmem:[%s1106_s3] sm:$0xff]  ;;  %v68_v41 = vld [vmem:[%s1107_s4 + $0x8] sm:$0xff] }
   0xc   :  { %768 = vmatpush1.bf16.msra.mxu1 %v953_v32  ;;  %v993_v52 = vpack.c.bf16 %v138_v44, %v134_v43  ;;  %v997_v54 = vsub.f32 %v94_v40, %v138_v44  ;;  %v1001_v56 = vsel %vm117_vm1, %v96_v46, 0  ;;  %v1008_v58 = vand.u32 4294901760, %v999_v55  ;;  %v66_v40 = vld [vmem:[%s1106_s3 + $0x8] sm:$0xff]  ;;  %s878_s3 = smov [#allocation3]  }
   0xd   :  { %794 = vmatprep.subr.bf16.mxu0 %v986_v49  ;;  %770 = vmatprep.subr.bf16.mxu1 %v986_v49  ;;  %v1012_v59 = vand.u32 4294901760, %v1001_v56  ;;  %v797_v60 = vpack.c.bf16 %v235_v48, %v223_v47  ;;  %v229_v61 = vand.u32 4294901760, %v965_v37  ;;  %v241_v62 = vand.u32 4294901760, %v967_v38  ;;  %s751_s4 = sshll.u32 %s878_s3, 4  ;;  %s752_s4 = int_to_ptr.vmem [resolvable:$true] %s751_s4 }
   0xe   :  { %v224_v0 = vsub.f32 %v961_v35, %v223_v47  ;;  %v236_v1 = vsub.f32 %v963_v36, %v235_v48  ;;  %v247_v6 = vand.u32 4294901760, %v988_v50  ;;  %v259_v7 = vand.u32 4294901760, %v990_v51  ;;  %p857_p1 = scmp.lt.s32.totalorder %s752_s4, %s752_s4 }
   0xf   :  { %796 = vmatpush1.bf16.msra.mxu0 %v993_v52  ;;  %v1019_v63 = vpack.c.bf16 %v241_v62, %v229_v61  ;;  %v230_v2 = vsub.f32 %v965_v37, %v229_v61  ;;  %v242_v3 = vsub.f32 %v967_v38, %v241_v62  ;;  %v783_v27 = vpack.c.bf16 %v967_v38, %v965_v37 }
  0x10   :  { %468 = vmatprep.subr.mxu0 %v1008_v58  ;;  %772 = vmatpush1.bf16.msra.mxu1 %v993_v52  ;;  %v225_v4 = vand.u32 4294901760, %v224_v0  ;;  %v237_v5 = vand.u32 4294901760, %v236_v1  ;;  %v785_v28 = vpack.c.bf16 %v990_v51, %v988_v50  ;;  %v787_v29 = vpack.c.bf16 %v997_v54, %v995_v53 }
  0x11   :  { %141 = vmatprep.subr.mxu1 %v1008_v58  ;;  %v69_v39 = vmul.f32 %v67_v34, %v65_v33  ;;  %v70_v44 = vmul.f32 %v68_v41, %v66_v40  ;;  %v270_v61 = vsub.f32 %v999_v55, %v1008_v58  ;;  %v276_v1 = vsub.f32 %v1001_v56, %v1012_v59 }
  0x13   :  { %470 = vmatpush1.msra.mxu0 %v1012_v59 }
  0x14   :  { %798 = vmatprep.subr.bf16.mxu0 %v797_v60  ;;  %143 = vmatpush1.msra.mxu1 %v1012_v59 }
  0x93   :  { %v45_v9 = vpop.xlane.xlu0 %44 }
  0x94   :  { %v51_v10 = vadd.f32 %v49_v8, %v45_v9  ;;  %v231_v8 = vand.u32 4294901760, %v230_v2  ;;  %v243_v9 = vand.u32 4294901760, %v242_v3 }
  0x96   :  { %v763_v12 = vmul.f32 -1.442695, %v51_v10  ;;  %v253_v10 = vand.u32 4294901760, %v995_v53 }
  0x97   :  { %v48_v13 = vpop.xlane.xlu0 %47 }
  0x98   :  { %844 = vpow2.f32 %v763_v12  ;;  %v52_v14 = vadd.f32 %v50_v11, %v48_v13  ;;  %v265_v11 = vand.u32 4294901760, %v997_v54  ;;  %v773_v12 = vpack.c.bf16 %v237_v5, %v225_v4 }
  0x99   :  { %v801_v13 = vpack.c.bf16 %v259_v7, %v247_v6  ;;  %v271_v5 = vand.u32 4294901760, %v270_v61 }
  0x9a   :  { %v764_v15 = vmul.f32 -1.442695, %v52_v14  ;;  %v248_v14 = vsub.f32 %v988_v50, %v247_v6  ;;  %774 = vmatprep.subr.bf16.mxu1 %v773_v12 }
  0x9c   :  { %846 = vpow2.f32 %v764_v15  ;;  %v260_v15 = vsub.f32 %v990_v51, %v259_v7 }
  0x9e   :  { %v261_v21 = vand.u32 4294901760, %v260_v15 }
  0xa2   :  { %v845_v16 = vpop.eup %844 }
  0xa3   :  { %v59_v17 = vadd.f32 1.0, %v845_v16  ;;  %v775_v16 = vpack.c.bf16 %v243_v9, %v231_v8  ;;  %v277_v8 = vand.u32 4294901760, %v276_v1 }
  0xa5   :  { %848 = vrcp.f32 %v59_v17  ;;  %v803_v17 = vpack.c.bf16 %v265_v11, %v253_v10  ;;  %v278_v56 = vsub.f32 %v276_v1, %v277_v8 }
  0xa6   :  { %v847_v18 = vpop.eup %846 }
  0xa7   :  { %v60_v19 = vadd.f32 1.0, %v847_v18  ;;  %v254_v18 = vsub.f32 %v995_v53, %v253_v10  ;;  %v272_v10 = vsub.f32 %v270_v61, %v271_v5 }
  0xa9   :  { %850 = vrcp.f32 %v60_v19  ;;  %v266_v19 = vsub.f32 %v997_v54, %v265_v11  ;;  %v255_v22 = vand.u32 4294901760, %v254_v18 }
  0xab   :  { %v267_v23 = vand.u32 4294901760, %v266_v19 }
  0xad   :  { %v779_v25 = vpack.c.bf16 %v267_v23, %v255_v22 }
  0xaf   :  { %v849_v20 = vpop.eup %848 }
  0xb0   :  { %73 = vperm.xlu1 %842, %v849_v20   ;;  %v249_v20 = vand.u32 4294901760, %v248_v14 }
  0xb2   :  { %v777_v24 = vpack.c.bf16 %v261_v21, %v249_v20 }
  0xb3   :  { %v851_v26 = vpop.eup %850 }
  0xb4   :  { %78 = vperm.xlu1 %842, %v851_v26   ;;  %v781_v26 = vpack.c.bf16 %v963_v36, %v961_v35 }
  0xb8   :  { %107 = vperm.xlu1 %842, %v99_v30   ;;  %v98_v30 = vld [vmem:[%s1108_s5] sm:$0xff]  ;;  %s852_s5 = scalar_lea.vmem %s752_s4, 512 }
  0xb9   :  { %102 = vperm.xlu0 %843, %v98_v30   ;;  %p853_p0 = scmp.ne.s32.totalorder %s752_s4, %s852_s5  ;;  %p858_p2 = scmp.lt.s32.totalorder %s852_s5, %s852_s5 }
  0xbb   :  { %p859_p3 = por %p858_p2, %p857_p1 }
  0xbd   :  { %p860_p4 = pnand %p859_p3, %p853_p0 }
 0x12f   :  { %v74_v42 = vpop.permute.xlu1 %73 }
 0x130   :  { %v81_v43 = vmul.f32 %v74_v42, %v69_v39 }
 0x132   :  { %84 = vst.msk [vmem:[#allocation2] sm:$0xff] %vm83_vm2, %v81_v43 }
 0x133   :  { %v79_v45 = vpop.permute.xlu1 %78 }
 0x134   :  { %v82_v46 = vmul.f32 %v79_v45, %v70_v44 }
 0x136   :  { %85 = vst.msk [vmem:[#allocation2 + $0x8] sm:$0xff] %vm83_vm2, %v82_v46 }
 0x137   :  { %v108_v53 = vpop.permute.xlu1 %107 }
 0x138   :  { %v103_v35 = vpop.permute.xlu0 %102 }
 0x139   :  { %v86_v47 = vld [vmem:[#allocation2] sm:$0xff] }
 0x13a   :  { %v112_v48 = vsel %vm83_vm2, %v86_v47, 0 }
 0x13b   :  { %v199_v60 = vand.u32 4294901760, %v112_v48 }
 0x13d   :  { %v200_v62 = vsub.f32 %v112_v48, %v199_v60  ;;  %v87_v0 = vld [vmem:[#allocation2 + $0x8] sm:$0xff] }
 0x13e   :  { %v115_v2 = vsel %vm83_vm2, %v87_v0, 0 }
 0x13f   :  { %v201_v3 = vand.u32 4294901760, %v200_v62  ;;  %v210_v4 = vand.u32 4294901760, %v115_v2 }
 0x141   :  { %529 = vmatmul.mubr.f32.vlgmr.msra.gmra.mrb[0].mxu0 %v201_v3  ;;  %v202_v6 = vsub.f32 %v200_v62, %v201_v3  ;;  %v211_v7 = vsub.f32 %v115_v2, %v210_v4 }
 0x142   :  { %800 = vmatpush1.bf16.msra.mxu0 %v1019_v63  ;;  %534 = vmatprep.mubr.f32.mxu0 %v877_v57  ;;  %v273_v63 = vand.u32 4294901760, %v272_v10 }
 0x143   :  { %802 = vmatprep.subr.bf16.mxu0 %v801_v13  ;;  %v203_v9 = vand.u32 4294901760, %v202_v6  ;;  %v212_v55 = vand.u32 4294901760, %v211_v7  ;;  %v279_v13 = vand.u32 4294901760, %v278_v56 }
 0x145   :  { %204 = vmatmul.mubr.f32.vlgmr.msra.gmra.mrb[0].mxu1 %v203_v9  ;;  %538 = vmatmul.mubr.f32.gmra.mrb[2].mxu0 %v212_v55  ;;  %v213_v11 = vsub.f32 %v211_v7, %v212_v55 }
 0x146   :  { %776 = vmatpush1.bf16.msra.mxu1 %v775_v16  ;;  %804 = vmatpush1.bf16.msra.mxu0 %v803_v17 }
 0x147   :  { %209 = vmatprep.mubr.f32.mxu1 %v877_v57  ;;  %778 = vmatprep.subr.bf16.mxu1 %v777_v24  ;;  %v214_v12 = vand.u32 4294901760, %v213_v11 }
 0x148   :  { %579 = vmatprep.subr.mxu0 %v271_v5  ;;  %638 = vmatprep.mubr.f32.mxu0 %v877_v57 }
 0x149   :  { %215 = vmatmul.mubr.f32.gmra.mrb[2].mxu1 %v214_v12 }
 0x14a   :  { %780 = vmatpush1.bf16.msra.mxu1 %v779_v25  ;;  %583 = vmatpush1.msra.mxu0 %v277_v8 }
 0x14b   :  { %640 = vmatmul.mubr.f32.vlgmr.msra.gmra.mrb[0].mxu0 %v199_v60  ;;  %806 = vmatprep.subr.bf16.mxu0 %v951_v31 }
 0x14c   :  { %808 = vmatpush1.bf16.msra.mxu0 %v953_v32  ;;  %274 = vmatprep.subr.mxu1 %v273_v63 }
 0x14d   :  { %335 = vmatprep.mubr.f32.mxu1 %v877_v57  ;;  %645 = vmatprep.mubr.f32.mxu0 %v877_v57 }
 0x14e   :  { %280 = vmatpush1.msra.mxu1 %v279_v13  ;;  %810 = vmatprep.subr.bf16.mxu0 %v986_v49 }
 0x14f   :  { %337 = vmatmul.mubr.f32.vlgmr.msra.gmra.mrb[0].mxu1 %v199_v60  ;;  %782 = vmatprep.subr.bf16.mxu1 %v781_v26 }
 0x150   :  { %647 = vmatmul.mubr.f32.gmra.mrb[2].mxu0 %v210_v4  ;;  %784 = vmatpush1.bf16.msra.mxu1 %v783_v27 }
 0x151   :  { %812 = vmatpush1.bf16.msra.mxu0 %v993_v52  ;;  %342 = vmatprep.mubr.f32.mxu1 %v877_v57 }
 0x152   :  { %786 = vmatprep.subr.bf16.mxu1 %v785_v28  ;;  %670 = vmatprep.subr.mxu0 %v1008_v58 }
 0x153   :  { %344 = vmatmul.mubr.f32.gmra.mrb[2].mxu1 %v210_v4  ;;  %727 = vmatprep.mubr.f32.mxu0 %v877_v57 }
 0x154   :  { %788 = vmatpush1.bf16.msra.mxu1 %v787_v29  ;;  %434 = vmatprep.mubr.f32.mxu1 %v877_v57 }
 0x155   :  { %672 = vmatpush1.msra.mxu0 %v1012_v59  ;;  %376 = vmatprep.subr.mxu1 %v270_v61 }
 0x156   :  { %729 = vmatmul.mubr.f32.vlgmr.msra.gmra.mrb[0].mxu0 %v199_v60 }
 0x157   :  { %734 = vmatprep.mubr.f32.mxu0 %v877_v57 }
 0x158   :  { %379 = vmatpush1.msra.mxu1 %v276_v1 }
 0x159   :  { %437 = vmatmul.mubr.f32.vlgmr.msra.gmra.mrb[0].mxu1 %v200_v62 }
 0x15a   :  { %736 = vmatmul.mubr.f32.gmra.mrb[2].mxu0 %v210_v4  ;;  %442 = vmatprep.mubr.f32.mxu1 %v877_v57 }
 0x15d   :  { %445 = vmatmul.mubr.f32.gmra.mrb[2].mxu1 %v211_v7 }
 0x229   :  { %v730_v31 = vpop.f32.mrb[0].mxu0 }
 0x22a   :  { %v732_v32 = vpop.f32.mrb[1].mxu0 }
 0x22c   :  { %v438_v36 = vpop.f32.mrb[0].mxu1 }
 0x22d   :  { %v737_v37 = vpop.f32.mrb[2].mxu0  ;;  %v813_v38 = vadd.f32 %v438_v36, %v103_v35  ;;  %v440_v49 = vpop.f32.mrb[1].mxu1 }
 0x22e   :  { %v815_v50 = vadd.f32 %v440_v49, %v103_v35  ;;  %v739_v51 = vpop.f32.mrb[3].mxu0 }
 0x22f   :  { %v814_v52 = vadd.f32 %v813_v38, %v730_v31 }
 0x230   :  { %v816_v54 = vadd.f32 %v815_v50, %v732_v32  ;;  %v446_v58 = vpop.f32.mrb[2].mxu1 }
 0x231   :  { %742 = vst [vmem:[#allocation3] sm:$0xff] %v814_v52  ;;  %v817_v59 = vadd.f32 %v446_v58, %v108_v53  ;;  %v448_v14 = vpop.f32.mrb[3].mxu1 }
 0x232   :  { %743 = vst [vmem:[#allocation3 + $0x8] sm:$0xff] %v816_v54  ;;  %v819_v57 = vadd.f32 %v448_v14, %v108_v53 }
 0x233   :  { %v818_v15 = vadd.f32 %v817_v59, %v737_v37 }
 0x234   :  { %v820_v16 = vadd.f32 %v819_v57, %v739_v51 }
 0x235   :  { %744 = vst [vmem:[#allocation3 + $0x10] sm:$0xff] %v818_v15 }
 0x236   :  { %745 = vst [vmem:[#allocation3 + $0x18] sm:$0xff] %v820_v16 }
 0x237   :  { %863 = shalt.err (!%p860_p4)
}
 0x238   :  { %s864_s15 = scalar_lea.hbm %s1110_s7, 512 }
 0x239   :  { %p865_p5 = scmp.ne.s32.totalorder %s1110_s7, %s864_s15  ;;  %p868_p6 = scmp.lt.u32.totalorder %s864_s15, %s1110_s7 }
 0x23b   :  { %p870_p7 = pnand %p868_p6, %p865_p5 }
 0x23d   :  { %873 = shalt.err (!%p870_p7)
}
 0x23e   :  { %s879_s20 = smov 256   ;;  %s880_s21 = smov 16  }
 0x23f   :  { %757 = dma.vmem_to_hbm [thread:$0]  %s752_s4, 512, %s1110_s7, [#allocation4], %s879_s20, %s879_s20, %s880_s21  }
 0x240   :  { %874 = dma.done.wait [#allocation4], 512  }
 0x241   :  { %875 = vsyncadd [#allocation4], 4294966784 }
 0x242   :  { %761 = vsyncpa [#allocation4], 1 }

</bundles_post_ra>
